<compile_context>
chip_gen: v7x
topology: tpu7x:2x2x1
jax: 0.10.0
libtpu: 0.0.40
codegen_flags: <defaults>
</compile_context>

<pallas_src>
import jax
import jax.numpy as jnp
from jax.experimental import pallas as pl
from jax.experimental.pallas import tpu as pltpu

KERNEL_SET = (2, 3, 6, 7)
_LANE = 128


def _fused_matmul_kernel(w_ref, x_ref, b_ref, o_ref):
    # w_ref: (R, K)  x_ref: (K, TM)  b_ref: (R, 1)  o_ref: (R, TM)
    acc = jnp.dot(w_ref[...], x_ref[...], preferred_element_type=jnp.float32)
    o_ref[...] = (acc + b_ref[...]).astype(o_ref.dtype)


def _build_fused_weight(weights, biases, cin, T, t_out, dilation, dtype):
    """Block-Toeplitz weight (Cout*T_out, Cin*T) and bias column (Cout*T_out, 1).

    Row r = cout*T_out + t, col q = cin*T + s; nonzero iff s = t + dil*(kmax-kern+k)
    for one of the branch taps.  Encodes conv + truncate-to-last-T_out + concat.
    """
    k_max = KERNEL_SET[-1]
    co = weights[0].shape[0]
    cout = co * len(KERNEL_SET)

    w4 = jnp.zeros((cout, t_out, cin, T), jnp.float32)
    for bi, kern in enumerate(KERNEL_SET):
        w = weights[bi].astype(jnp.float32)                 # (co, cin, 1, kern)
        for k in range(kern):
            shift = dilation * (k_max - kern + k)
            sel = jnp.eye(t_out, T, k=shift, dtype=jnp.float32)          # (t_out, T)
            contrib = w[:, :, 0, k][:, None, :, None] * sel[None, :, None, :]
            w4 = w4.at[bi * co:(bi + 1) * co].add(contrib)   # (co, t_out, cin, T)
    w_big = w4.reshape(cout * t_out, cin * T).astype(dtype)

    b_cat = jnp.concatenate([b.astype(jnp.float32) for b in biases], axis=0)  # (cout,)
    b_col = jnp.broadcast_to(b_cat[:, None], (cout, t_out)).reshape(-1, 1)
    return w_big, b_col.astype(jnp.float32)


def dilated_inception_pallas(x_nchw, weights, biases, dilation=1, block_m=512):
    """x_nchw: (B, Cin, N, T). weights[i]: (Co, Cin, 1, k_i), biases[i]: (Co,).
    Returns (B, Cout, N, T_out) matching the PyTorch dilated_inception."""
    B, cin, N, T = x_nchw.shape
    co = weights[0].shape[0]
    cout = co * len(KERNEL_SET)
    k_max = KERNEL_SET[-1]
    t_out = T - dilation * (k_max - 1)
    assert t_out > 0, "input time dim too short for dilation/kernel set"

    w_big, b_col = _build_fused_weight(
        weights, biases, cin, T, t_out, dilation, x_nchw.dtype)
    R, K = w_big.shape

    M = B * N
    # Lane-dense tiling over M: multiples of 128, a few hundred KiB-MiB per block.
    tm = block_m if M >= block_m else max(_LANE, ((M + _LANE - 1) // _LANE) * _LANE)
    m_pad = ((M + tm - 1) // tm) * tm

    # (B, Cin, N, T) -> (Cin, T, B, N) -> (Cin*T, M): M on the lane axis, the
    # time shifts are baked into W_big so the kernel never slices.
    x_flat = jnp.transpose(x_nchw, (1, 3, 0, 2)).reshape(cin * T, M)
    if m_pad != M:
        x_flat = jnp.pad(x_flat, ((0, 0), (0, m_pad - M)))

    out_flat = pl.pallas_call(
        _fused_matmul_kernel,
        out_shape=jax.ShapeDtypeStruct((R, m_pad), x_nchw.dtype),
        grid_spec=pltpu.PrefetchScalarGridSpec(
            num_scalar_prefetch=0,
            grid=(m_pad // tm,),
            in_specs=[
                pl.BlockSpec((R, K), lambda i: (0, 0)),   # fused weight, resident
                pl.BlockSpec((K, tm), lambda i: (0, i)),  # x block, lane-dense
                pl.BlockSpec((R, 1), lambda i: (0, 0)),   # bias column, resident
            ],
            out_specs=pl.BlockSpec((R, tm), lambda i: (0, i)),
        ),
        compiler_params=pltpu.CompilerParams(
            dimension_semantics=("parallel",),
            vmem_limit_bytes=48 * 1024 * 1024,
        ),
    )(w_big, x_flat, b_col)

    # (Cout*T_out, M) -> (B, Cout, N, T_out)  (NCHW, like PyTorch)
    out = out_flat[:, :M].reshape(cout, t_out, B, N)
    return jnp.transpose(out, (2, 0, 3, 1))


def dilated_inception_ref(x, weights, biases, dilation=1):
    """Plain-JAX reference mirroring the PyTorch module (NCHW)."""
    B, cin, N, T = x.shape
    k_max = KERNEL_SET[-1]
    t_out = T - dilation * (k_max - 1)
    outs = []
    for bi, kern in enumerate(KERNEL_SET):
        w, b = weights[bi], biases[bi]
        off = dilation * (k_max - kern)
        co = w.shape[0]
        acc = jnp.zeros((B, co, N, t_out), jnp.float32)
        for k in range(kern):
            s = off + k * dilation
            xs = x[:, :, :, s:s + t_out]                   # (B, Cin, N, T_out)
            acc = acc + jnp.einsum('bcnt,oc->bont', xs, w[:, :, 0, k])
        outs.append(acc + b[None, :, None, None])
    return jnp.concatenate(outs, axis=1)


if __name__ == "__main__":
    # Small shapes consistent with the module: B=2, Cin=4, Cout=8, N=16, T=16.
    B, CIN, COUT, N, T = 2, 4, 8, 16, 16
    CO = COUT // len(KERNEL_SET)

    key = jax.random.PRNGKey(0)
    key, kx = jax.random.split(key)
    x = jax.random.normal(kx, (B, CIN, N, T), dtype=jnp.float32)

    weights, biases = [], []
    for kern in KERNEL_SET:
        key, kw, kb = jax.random.split(key, 3)
        weights.append(
            0.1 * jax.random.normal(kw, (CO, CIN, 1, kern), dtype=jnp.float32))
        biases.append(
            0.1 * jax.random.normal(kb, (CO,), dtype=jnp.float32))

    for dil in (1, 2):
        out = jax.block_until_ready(
            dilated_inception_pallas(x, weights, biases, dilation=dil))
        ref = dilated_inception_ref(x, weights, biases, dilation=dil)
        assert out.shape == ref.shape == (B, COUT, N, T - dil * 6), out.shape
        err = float(jnp.max(jnp.abs(out - ref)))
        assert err < 1e-4, err

    print("KERNEL_OK")
</pallas_src>

<mosaic_0001>
module attributes {stable_mosaic.version = 11 : i64} {
  func.func @_fused_matmul_kernel(%arg0: i32, %arg1: memref<80x64xf32, #tpu.memory_space<vmem>>, %arg2: memref<64x128xf32, #tpu.memory_space<vmem>>, %arg3: memref<80x1xf32, #tpu.memory_space<vmem>>, %arg4: memref<80x128xf32, #tpu.memory_space<vmem>>) attributes {dimension_semantics = [#tpu.dimension_semantics<parallel>], iteration_bounds = array<i64: 1>, scalar_prefetch = 0 : i64, scratch_operands = 0 : i64, tpu.core_type = #tpu.core_type<tc>, window_params = [{pipeline_mode = #tpu.pipeline_mode<synchronous>, transform_indices = @transform_0, window_bounds = array<i64: 80, 64>}, {transform_indices = @transform_1, window_bounds = array<i64: 64, 128>}, {pipeline_mode = #tpu.pipeline_mode<synchronous>, transform_indices = @transform_2, window_bounds = array<i64: 80, 1>}, {transform_indices = @transform_3, window_bounds = array<i64: 80, 128>}]} {
    %c0 = arith.constant 0 : index
    %c0_0 = arith.constant 0 : index
    %0 = vector.load %arg1[%c0, %c0_0] : memref<80x64xf32, #tpu.memory_space<vmem>>, vector<80x64xf32>
    %c0_1 = arith.constant 0 : index
    %c0_2 = arith.constant 0 : index
    %1 = vector.load %arg2[%c0_1, %c0_2] : memref<64x128xf32, #tpu.memory_space<vmem>>, vector<64x128xf32>
    %cst = arith.constant dense<0.000000e+00> : vector<80x128xf32>
    %2 = tpu.matmul %0, %1, %cst {dimension_numbers = #tpu.dot_dimension_numbers<[1], [0], [0], [1], [0, 0, 1, 1], [], []>} : vector<80x64xf32>, vector<64x128xf32>, vector<80x128xf32> -> vector<80x128xf32>
    %c0_3 = arith.constant 0 : index
    %c0_4 = arith.constant 0 : index
    %3 = vector.load %arg3[%c0_3, %c0_4] : memref<80x1xf32, #tpu.memory_space<vmem>>, vector<80x1xf32>
    %4 = vector.broadcast %3 : vector<80x1xf32> to vector<80x128xf32>
    %5 = arith.addf %2, %4 : vector<80x128xf32>
    %c0_5 = arith.constant 0 : index
    %c0_6 = arith.constant 0 : index
    %6 = vector.load %arg4[%c0_5, %c0_6] : memref<80x128xf32, #tpu.memory_space<vmem>>, vector<80x128xf32>
    tpu.vector_store %arg4[%c0_5, %c0_6], %5 {strides = array<i32>} : memref<80x128xf32, #tpu.memory_space<vmem>>, vector<80x128xf32>,
    return
  }
  func.func @transform_0(%arg0: i32) -> (i32, i32) {
    %c0_i32 = arith.constant 0 : i32
    %c0_i32_0 = arith.constant 0 : i32
    %c0_i32_1 = arith.constant 0 : i32
    return %c0_i32, %c0_i32_0 : i32, i32
  }
  func.func @transform_1(%arg0: i32) -> (i32, i32) {
    %c0_i32 = arith.constant 0 : i32
    %c0_i32_0 = arith.constant 0 : i32
    return %c0_i32, %arg0 : i32, i32
  }
  func.func @transform_2(%arg0: i32) -> (i32, i32) {
    %c0_i32 = arith.constant 0 : i32
    %c0_i32_0 = arith.constant 0 : i32
    %c0_i32_1 = arith.constant 0 : i32
    return %c0_i32, %c0_i32_0 : i32, i32
  }
  func.func @transform_3(%arg0: i32) -> (i32, i32) {
    %c0_i32 = arith.constant 0 : i32
    %c0_i32_0 = arith.constant 0 : i32
    return %c0_i32, %arg0 : i32, i32
  }
}

</mosaic_0001>

<bundles_post_ra>
// kernel: tpu_custom_call.1
= control target key start
LH: loop header
LB: loop body
LE: loop exit
PB: predicated region body
PF: predicated region fallthrough
CT: control target
= control target key end

     0   :  { %v378_v5 = vmov 0   ;;  %vm93_vm0 = vcmask 523264   ;;  %s508_s0 = inlined_call_operand.vmem [shape: f32[80,64], index: 0, kind: input, shape index: {}]   ;;  %s509_s1 = inlined_call_operand.vmem [shape: f32[64,128], index: 1, kind: input, shape index: {}]   ;;  %s510_s2 = inlined_call_operand.vmem [shape: f32[80,1], index: 2, kind: input, shape index: {}]   ;;  %s511_s3 = inlined_call_operand.hbm [shape: f32[80,128], index: 3, kind: output, shape index: {}]  }
   0x1   :  { %v25_v0 = vld [vmem:[%s509_s1] sm:$0xff]  ;;  %v26_v1 = vld [vmem:[%s509_s1 + $0x8] sm:$0xff]  ;;  %v27_v2 = vld [vmem:[%s509_s1 + $0x10] sm:$0xff]  ;;  %353 = vset.pattern.permute.xlu1 %v378_v5  ;;  %352 = vset.pattern.permute.xlu0 %v378_v5 }
   0x2   :  { %v324_v3 = vpack.c.bf16 %v26_v1, %v25_v0  ;;  %v28_v4 = vld [vmem:[%s509_s1 + $0x18] sm:$0xff]  ;;  %v29_v7 = vld [vmem:[%s509_s1 + $0x20] sm:$0xff]  ;;  %v30_v8 = vld [vmem:[%s509_s1 + $0x28] sm:$0xff] }
   0x3   :  { %v328_v6 = vpack.c.bf16 %v28_v4, %v27_v2  ;;  %v15_v9 = vld [vmem:[%s508_s0] sm:$0xff]  ;;  %v21_v10 = vld [vmem:[%s508_s0 + $0x30] sm:$0xff]  ;;  %v332_v11 = vpack.c.bf16 %v30_v8, %v29_v7  ;;  %v32_v13 = vld [vmem:[%s509_s1 + $0x38] sm:$0xff] }
   0x4   :  { %325 = vmatprep.subr.bf16.mxu0 %v324_v3  ;;  %340 = vmatprep.subr.bf16.mxu1 %v324_v3  ;;  %v31_v12 = vld [vmem:[%s509_s1 + $0x30] sm:$0xff]  ;;  %v33_v15 = vld [vmem:[%s510_s2] sm:$0xff]  ;;  %v36_v16 = vld [vmem:[%s510_s2 + $0x18] sm:$0xff] }
   0x5   :  { %327 = vmatpush3.bf16.msra.mxu0 %v324_v3  ;;  %344 = vmatpush3.bf16.msra.mxu1 %v324_v3  ;;  %v35_v14 = vld [vmem:[%s510_s2 + $0x10] sm:$0xff]  ;;  %v34_v17 = vld [vmem:[%s510_s2 + $0x8] sm:$0xff]  ;;  %v336_v18 = vpack.c.bf16 %v32_v13, %v31_v12 }
   0x6   :  { %329 = vmatprep.subr.bf16.mxu0 %v328_v6  ;;  %341 = vmatprep.subr.bf16.mxu1 %v328_v6 }
   0x7   :  { %309 = vmatprep.mubr.msk.f32.mxu0 %vm93_vm0, %v15_v9  ;;  %318 = vmatprep.mubr.msk.f32.mxu1 %vm93_vm0, %v21_v10 }
   0x8   :  { %55 = vperm.xlu1 %353, %v35_v14   ;;  %45 = vperm.xlu0 %352, %v33_v15  }
   0x9   :  { %331 = vmatpush3.bf16.msra.mxu0 %v328_v6  ;;  %345 = vmatpush3.bf16.msra.mxu1 %v328_v6 }
   0xa   :  { %333 = vmatprep.subr.bf16.mxu0 %v332_v11  ;;  %342 = vmatprep.subr.bf16.mxu1 %v332_v11 }
   0xb   :  { %8 = vsyncpa [#allocation3], 0  ;;  %v38_v19 = vld [vmem:[%s510_s2 + $0x28] sm:$0xff]  ;;  %v37_v20 = vld [vmem:[%s510_s2 + $0x20] sm:$0xff] }
   0xc   :  { %60 = vperm.xlu1 %353, %v36_v16   ;;  %50 = vperm.xlu0 %352, %v34_v17   ;;  %v16_v21 = vld [vmem:[%s508_s0 + $0x8] sm:$0xff]  ;;  %v22_v22 = vld [vmem:[%s508_s0 + $0x38] sm:$0xff]  ;;  %v17_v23 = vld [vmem:[%s508_s0 + $0x10] sm:$0xff] }
   0xd   :  { %335 = vmatpush3.bf16.msra.mxu0 %v332_v11  ;;  %346 = vmatpush3.bf16.msra.mxu1 %v332_v11  ;;  %v23_v24 = vld [vmem:[%s508_s0 + $0x40] sm:$0xff]  ;;  %v40_v25 = vld [vmem:[%s510_s2 + $0x38] sm:$0xff]  ;;  %v39_v26 = vld [vmem:[%s510_s2 + $0x30] sm:$0xff] }
   0xe   :  { %337 = vmatprep.subr.bf16.mxu0 %v336_v18  ;;  %343 = vmatprep.subr.bf16.mxu1 %v336_v18  ;;  %v18_v27 = vld [vmem:[%s508_s0 + $0x18] sm:$0xff]  ;;  %v24_v28 = vld [vmem:[%s508_s0 + $0x48] sm:$0xff]  ;;  %v19_v29 = vld [vmem:[%s508_s0 + $0x20] sm:$0xff] }
   0xf   :  { %v42_v30 = vld [vmem:[%s510_s2 + $0x48] sm:$0xff]  ;;  %v41_v31 = vld [vmem:[%s510_s2 + $0x40] sm:$0xff] }
  0x10   :  { %70 = vperm.xlu1 %353, %v38_v19   ;;  %65 = vperm.xlu0 %352, %v37_v20   ;;  %v20_v32 = vld [vmem:[%s508_s0 + $0x28] sm:$0xff]  ;;  %s379_s0 = smov [#allocation2]  }
  0x11   :  { %339 = vmatpush3.bf16.msra.mxu0 %v336_v18  ;;  %347 = vmatpush3.bf16.msra.mxu1 %v336_v18  ;;  %s254_s2 = sshll.u32 %s379_s0, 4  ;;  %s255_s2 = int_to_ptr.vmem [resolvable:$true] %s254_s2 }
  0x12   :  { %s354_s12 = scalar_lea.vmem %s255_s2, 1280  ;;  %p359_p1 = scmp.lt.s32.totalorder %s255_s2, %s255_s2 }
  0x13   :  { %p355_p0 = scmp.ne.s32.totalorder %s255_s2, %s354_s12  ;;  %p360_p2 = scmp.lt.s32.totalorder %s354_s12, %s354_s12 }
  0x14   :  { %310 = vmatmul.mubr.msk.f32.vlgmr.msra.gmra.mrb[0].mxu0 %vm93_vm0, %v16_v21  ;;  %319 = vmatmul.mubr.msk.f32.vlgmr.msra.gmra.mrb[0].mxu1 %vm93_vm0, %v22_v22 }
  0x15   :  { %312 = vmatprep.mubr.msk.f32.mxu0 %vm93_vm0, %v17_v23  ;;  %321 = vmatprep.mubr.msk.f32.mxu1 %vm93_vm0, %v23_v24  ;;  %p361_p3 = por %p360_p2, %p359_p1 }
  0x16   :  { %80 = vperm.xlu1 %353, %v40_v25   ;;  %75 = vperm.xlu0 %352, %v39_v26  }
  0x17   :  { %p362_p4 = pnand %p361_p3, %p355_p0 }
  0x18   :  { %313 = vmatmul.mubr.msk.f32.gmra.mrb[2].mxu0 %vm93_vm0, %v18_v27  ;;  %322 = vmatmul.mubr.msk.f32.gmra.mrb[2].mxu1 %vm93_vm0, %v24_v28 }
  0x19   :  { %315 = vmatprep.mubr.msk.f32.mxu0 %vm93_vm0, %v19_v29 }
  0x1a   :  { %90 = vperm.xlu1 %353, %v42_v30   ;;  %85 = vperm.xlu0 %352, %v41_v31  }
  0x1c   :  { %316 = vmatmul.mubr.msk.f32.gmra.mrb[4].mxu0 %vm93_vm0, %v20_v32 }
  0x87   :  { %v56_v33 = vpop.permute.xlu1 %55  ;;  %v46_v34 = vpop.permute.xlu0 %45 }
  0x8b   :  { %v61_v35 = vpop.permute.xlu1 %60  ;;  %v51_v36 = vpop.permute.xlu0 %50 }
  0x8f   :  { %v71_v37 = vpop.permute.xlu1 %70  ;;  %v66_v38 = vpop.permute.xlu0 %65 }
  0x95   :  { %v81_v39 = vpop.permute.xlu1 %80  ;;  %v76_v40 = vpop.permute.xlu0 %75 }
  0x99   :  { %v91_v49 = vpop.permute.xlu1 %90  ;;  %v86_v50 = vpop.permute.xlu0 %85 }
  0xe7   :  { %v311_v41 = vpop.f32.mrb[0].mxu0  ;;  %v320_v42 = vpop.f32.mrb[0].mxu1 }
  0xe8   :  { %v196_v43 = vadd.f32 %v311_v41, %v51_v36  ;;  %v226_v44 = vadd.f32 %v320_v42, %v81_v39  ;;  %v190_v45 = vpop.f32.mrb[1].mxu0  ;;  %v220_v46 = vpop.f32.mrb[1].mxu1 }
  0xe9   :  { %v191_v47 = vadd.f32 %v190_v45, %v46_v34  ;;  %v221_v48 = vadd.f32 %v220_v46, %v76_v40 }
  0xea   :  { %240 = vst [vmem:[#allocation2 + $0x8] sm:$0xff] %v196_v43  ;;  %246 = vst [vmem:[#allocation2 + $0x38] sm:$0xff] %v226_v44 }
  0xeb   :  { %239 = vst [vmem:[#allocation2] sm:$0xff] %v191_v47  ;;  %245 = vst [vmem:[#allocation2 + $0x30] sm:$0xff] %v221_v48  ;;  %v314_v51 = vpop.f32.mrb[2].mxu0  ;;  %v323_v52 = vpop.f32.mrb[2].mxu1 }
  0xec   :  { %v206_v53 = vadd.f32 %v314_v51, %v61_v35  ;;  %v236_v54 = vadd.f32 %v323_v52, %v91_v49  ;;  %v200_v55 = vpop.f32.mrb[3].mxu0  ;;  %v230_v56 = vpop.f32.mrb[3].mxu1 }
  0xed   :  { %v201_v57 = vadd.f32 %v200_v55, %v56_v33  ;;  %v231_v58 = vadd.f32 %v230_v56, %v86_v50 }
  0xee   :  { %242 = vst [vmem:[#allocation2 + $0x18] sm:$0xff] %v206_v53  ;;  %248 = vst [vmem:[#allocation2 + $0x48] sm:$0xff] %v236_v54 }
  0xef   :  { %241 = vst [vmem:[#allocation2 + $0x10] sm:$0xff] %v201_v57  ;;  %247 = vst [vmem:[#allocation2 + $0x40] sm:$0xff] %v231_v58  ;;  %v317_v59 = vpop.f32.mrb[4].mxu0 }
  0xf0   :  { %v216_v60 = vadd.f32 %v317_v59, %v71_v37  ;;  %v210_v61 = vpop.f32.mrb[5].mxu0 }
  0xf1   :  { %v211_v62 = vadd.f32 %v210_v61, %v66_v38 }
  0xf2   :  { %244 = vst [vmem:[#allocation2 + $0x28] sm:$0xff] %v216_v60 }
  0xf3   :  { %243 = vst [vmem:[#allocation2 + $0x20] sm:$0xff] %v211_v62 }
  0xf4   :  { %365 = shalt.err (!%p362_p4)
}
  0xf5   :  { %s366_s15 = scalar_lea.hbm %s511_s3, 1280 }
  0xf6   :  { %p367_p5 = scmp.ne.s32.totalorder %s511_s3, %s366_s15  ;;  %p370_p6 = scmp.lt.u32.totalorder %s366_s15, %s511_s3 }
  0xf8   :  { %p372_p7 = pnand %p370_p6, %p367_p5 }
  0xfa   :  { %375 = shalt.err (!%p372_p7)
}
  0xfb   :  { %s380_s20 = smov 128   ;;  %s381_s21 = smov 8  }
  0xfc   :  { %260 = dma.vmem_to_hbm [thread:$0]  %s255_s2, 1280, %s511_s3, [#allocation3], %s380_s20, %s380_s20, %s381_s21  }
  0xfd   :  { %376 = dma.done.wait [#allocation3], 1280  }
  0xfe   :  { %377 = vsyncadd [#allocation3], 4294966016 }
  0xff   :  { %264 = vsyncpa [#allocation3], 1 }

</bundles_post_ra>
